<compile_context>
chip_gen: v7x
topology: tpu7x:2x2x1
jax: 0.10.0
libtpu: 0.0.40
codegen_flags: <defaults>
</compile_context>

<pallas_src>
import numpy as np
import jax
import jax.numpy as jnp
from jax import lax
from jax.experimental import pallas as pl
from jax.experimental.pallas import tpu as pltpu


# --------------------------------------------------------------------------
# Kernels
# --------------------------------------------------------------------------
def _conv3x3_relu_kernel(x_ref, w_ref, b_ref, o_ref):
    # x_ref: (H+2, W+2, Ci) zero-padded plane, w_ref: (3,3,Ci,Co),
    # b_ref: (1, Co), o_ref: (H, W, Co)
    H, W, Co = o_ref.shape
    bias = b_ref[...]                                   # (1, Co), loop-invariant
    wtaps = [[w_ref[dy, dx] for dx in range(3)] for dy in range(3)]

    @pl.loop(0, H)
    def _(h):
        acc = jnp.zeros((W, Co), jnp.float32)
        for dy in range(3):
            row = x_ref[pl.ds(h + dy, 1)][0]            # (W+2, Ci)
            for dx in range(3):
                acc += jnp.dot(row[dx:dx + W, :], wtaps[dy][dx],
                               preferred_element_type=jnp.float32)
        out = jnp.maximum(acc + bias, 0.0)
        o_ref[pl.ds(h, 1)] = out[None].astype(o_ref.dtype)


# phase a (row parity) / b (col parity) -> [(kernel tap, input shift), ...]
#   out[2h+a, 2w+b] = sum_{(ky,dh) in TAPS[a]} sum_{(kx,dw) in TAPS[b]}
#                       x[h+dh, w+dw, :] @ W[:, :, ky, kx]
_DECONV_TAPS = {0: ((1, 0), (3, -1)), 1: ((0, 1), (2, 0))}


def _deconv4x4_s2_relu_kernel(x_ref, w_ref, b_ref, o_ref):
    # x_ref: (H+2, W+2, Cm) zero-padded plane, w_ref: (4,4,Cm,Co),
    # b_ref: (1, Co), o_ref: (4, H, W, Co) with phase p = 2*a + b
    _, H, W, Co = o_ref.shape
    bias = b_ref[...]
    wtaps = [[w_ref[ky, kx] for kx in range(4)] for ky in range(4)]

    @pl.loop(0, H)
    def _(h):
        # the three input rows that feed output rows 2h and 2h+1
        rows = [x_ref[pl.ds(h + d, 1)][0] for d in range(3)]   # (W+2, Cm)
        for a in range(2):
            for b in range(2):
                acc = jnp.zeros((W, Co), jnp.float32)
                for ky, dh in _DECONV_TAPS[a]:
                    row = rows[dh + 1]
                    for kx, dw in _DECONV_TAPS[b]:
                        acc += jnp.dot(row[1 + dw:1 + dw + W, :], wtaps[ky][kx],
                                       preferred_element_type=jnp.float32)
                out = jnp.maximum(acc + bias, 0.0)
                p = 2 * a + b
                o_ref[pl.ds(p, 1), pl.ds(h, 1)] = out[None, None].astype(o_ref.dtype)


# bilinear x2, align_corners=False:  even out = 0.25*x[k-1]+0.75*x[k],
#                                    odd  out = 0.75*x[k]+0.25*x[k+1]  (edge clamped)
_LERP_TAPS = {0: ((-1, 0.25), (0, 0.75)), 1: ((0, 0.75), (1, 0.25))}


def _bilinear2x_kernel(x_ref, o_ref):
    # x_ref: (H+2, W+2, C) edge-padded plane, o_ref: (4, H, W, C) phase-major
    _, H, W, C = o_ref.shape

    @pl.loop(0, H)
    def _(h):
        rows = [x_ref[pl.ds(h + d, 1)][0].astype(jnp.float32) for d in range(3)]
        for a in range(2):
            for b in range(2):
                acc = jnp.zeros((W, C), jnp.float32)
                for dh, ch in _LERP_TAPS[a]:
                    row = rows[dh + 1]
                    for dw, cw in _LERP_TAPS[b]:
                        acc += (ch * cw) * row[1 + dw:1 + dw + W, :]
                p = 2 * a + b
                o_ref[pl.ds(p, 1), pl.ds(h, 1)] = acc[None, None].astype(o_ref.dtype)


# --------------------------------------------------------------------------
# Wrappers (layout plumbing + pallas_call)
# --------------------------------------------------------------------------
def conv3x3_relu_nhwc(x, w, b):
    """x: (N,H,W,Ci) NHWC;  w: (Co,Ci,3,3) PyTorch OIHW;  b: (Co,)."""
    N, H, W, Ci = x.shape
    Co = w.shape[0]
    xp = jnp.pad(x, ((0, 0), (1, 1), (1, 1), (0, 0)))
    wk = jnp.transpose(w, (2, 3, 1, 0)).astype(jnp.float32)        # (3,3,Ci,Co)
    bk = b.reshape(1, Co).astype(jnp.float32)
    return pl.pallas_call(
        _conv3x3_relu_kernel,
        out_shape=jax.ShapeDtypeStruct((N, H, W, Co), x.dtype),
        grid=(N,),
        in_specs=[
            pl.BlockSpec((None, H + 2, W + 2, Ci), lambda n: (n, 0, 0, 0)),
            pl.BlockSpec((3, 3, Ci, Co), lambda n: (0, 0, 0, 0)),
            pl.BlockSpec((1, Co), lambda n: (0, 0)),
        ],
        out_specs=pl.BlockSpec((None, H, W, Co), lambda n: (n, 0, 0, 0)),
        compiler_params=pltpu.CompilerParams(dimension_semantics=("parallel",)),
    )(xp, wk, bk)


def deconv4x4_s2_relu_nhwc(x, w, b):
    """x: (N,H,W,Cm);  w: (Cm,Co,4,4) PyTorch ConvTranspose2d layout;  b: (Co,)."""
    N, H, W, Cm = x.shape
    Co = w.shape[1]
    xp = jnp.pad(x, ((0, 0), (1, 1), (1, 1), (0, 0)))
    wk = jnp.transpose(w, (2, 3, 0, 1)).astype(jnp.float32)        # (4,4,Cm,Co)
    bk = b.reshape(1, Co).astype(jnp.float32)
    out = pl.pallas_call(
        _deconv4x4_s2_relu_kernel,
        out_shape=jax.ShapeDtypeStruct((N, 4, H, W, Co), x.dtype),
        grid=(N,),
        in_specs=[
            pl.BlockSpec((None, H + 2, W + 2, Cm), lambda n: (n, 0, 0, 0)),
            pl.BlockSpec((4, 4, Cm, Co), lambda n: (0, 0, 0, 0)),
            pl.BlockSpec((1, Co), lambda n: (0, 0)),
        ],
        out_specs=pl.BlockSpec((None, 4, H, W, Co), lambda n: (n, 0, 0, 0, 0)),
        compiler_params=pltpu.CompilerParams(dimension_semantics=("parallel",)),
    )(xp, wk, bk)
    out = out.reshape(N, 2, 2, H, W, Co)                 # (n, a, b, h, w, c)
    out = jnp.transpose(out, (0, 3, 1, 4, 2, 5))         # (n, h, a, w, b, c)
    return out.reshape(N, 2 * H, 2 * W, Co)


def bilinear_upsample2x_nhwc(x):
    """F.interpolate(mode='bilinear', align_corners=False, scale_factor=2) on NHWC."""
    N, H, W, C = x.shape
    xp = jnp.pad(x, ((0, 0), (1, 1), (1, 1), (0, 0)), mode="edge")
    out = pl.pallas_call(
        _bilinear2x_kernel,
        out_shape=jax.ShapeDtypeStruct((N, 4, H, W, C), x.dtype),
        grid=(N,),
        in_specs=[pl.BlockSpec((None, H + 2, W + 2, C), lambda n: (n, 0, 0, 0))],
        out_specs=pl.BlockSpec((None, 4, H, W, C), lambda n: (n, 0, 0, 0, 0)),
        compiler_params=pltpu.CompilerParams(dimension_semantics=("parallel",)),
    )(xp)
    out = out.reshape(N, 2, 2, H, W, C)
    out = jnp.transpose(out, (0, 3, 1, 4, 2, 5))
    return out.reshape(N, 2 * H, 2 * W, C)


# --------------------------------------------------------------------------
# Module
# --------------------------------------------------------------------------
class DecoderBlockV2:
    """JAX/Pallas equivalent of the PyTorch DecoderBlockV2 (inference)."""

    def __init__(self, in_channels, middle_channels, out_channels,
                 is_deconv=True, *, key=None, dtype=jnp.float32):
        if key is None:
            key = jax.random.PRNGKey(0)
        self.is_deconv = is_deconv
        k1, k2, k3, k4 = jax.random.split(key, 4)

        def _uniform(k, shape, fan_in):
            bound = 1.0 / float(np.sqrt(fan_in))
            return jax.random.uniform(k, shape, dtype, -bound, bound)

        # ConvRelu(in, mid): Conv2d(in, mid, 3, padding=1)
        self.w1 = _uniform(k1, (middle_channels, in_channels, 3, 3), in_channels * 9)
        self.b1 = _uniform(k2, (middle_channels,), in_channels * 9)
        if is_deconv:
            # ConvTranspose2d(mid, out, kernel_size=4, stride=2, padding=1)
            self.w2 = _uniform(k3, (middle_channels, out_channels, 4, 4),
                               out_channels * 16)
            self.b2 = _uniform(k4, (out_channels,), out_channels * 16)
        else:
            # ConvRelu(mid, out)
            self.w2 = _uniform(k3, (out_channels, middle_channels, 3, 3),
                               middle_channels * 9)
            self.b2 = _uniform(k4, (out_channels,), middle_channels * 9)

    def __call__(self, x):
        # x: (N, C, H, W), same as the PyTorch module.
        x = jnp.transpose(x, (0, 2, 3, 1))                       # NCHW -> NHWC
        if self.is_deconv:
            h = conv3x3_relu_nhwc(x, self.w1, self.b1)
            y = deconv4x4_s2_relu_nhwc(h, self.w2, self.b2)      # includes final ReLU
        else:
            u = bilinear_upsample2x_nhwc(x)
            h = conv3x3_relu_nhwc(u, self.w1, self.b1)
            y = conv3x3_relu_nhwc(h, self.w2, self.b2)
        return jnp.transpose(y, (0, 3, 1, 2))                    # NHWC -> NCHW


# --------------------------------------------------------------------------
# Pure-JAX references (match PyTorch semantics) + demo
# --------------------------------------------------------------------------
def _conv3x3_relu_ref(x, w, b):     # NCHW
    y = lax.conv_general_dilated(x, w, (1, 1), ((1, 1), (1, 1)),
                                 dimension_numbers=("NCHW", "OIHW", "NCHW"))
    return jnp.maximum(y + b[None, :, None, None], 0.0)


def _deconv4x4_s2_relu_ref(x, w, b):  # NCHW, w: (Cm, Co, 4, 4)
    wflip = jnp.transpose(w, (1, 0, 2, 3))[:, :, ::-1, ::-1]
    y = lax.conv_general_dilated(x, wflip, (1, 1), ((2, 2), (2, 2)),
                                 lhs_dilation=(2, 2),
                                 dimension_numbers=("NCHW", "OIHW", "NCHW"))
    return jnp.maximum(y + b[None, :, None, None], 0.0)


def _bilinear2x_ref(x):             # NCHW
    def up(v, axis):
        n = v.shape[axis]
        idx = jnp.arange(n)
        vm = jnp.take(v, jnp.clip(idx - 1, 0, n - 1), axis=axis)
        vp = jnp.take(v, jnp.clip(idx + 1, 0, n - 1), axis=axis)
        even = 0.25 * vm + 0.75 * v
        odd = 0.75 * v + 0.25 * vp
        out = jnp.stack([even, odd], axis=axis + 1)
        shape = list(v.shape)
        shape[axis] = 2 * n
        return out.reshape(shape)
    return up(up(x, 2), 3)


if __name__ == "__main__":
    key = jax.random.PRNGKey(0)
    kx, kp1, kp2 = jax.random.split(key, 3)
    N, Ci, H, W = 2, 4, 16, 16
    Cm, Co = 8, 8
    x = jax.random.normal(kx, (N, Ci, H, W), dtype=jnp.float32)

    # default path: ConvRelu -> ConvTranspose2d(4,2,1) -> ReLU
    blk = DecoderBlockV2(Ci, Cm, Co, is_deconv=True, key=kp1)
    out = jax.block_until_ready(blk(x))
    assert out.shape == (N, Co, 2 * H, 2 * W) and out.dtype == x.dtype
    ref = _deconv4x4_s2_relu_ref(_conv3x3_relu_ref(x, blk.w1, blk.b1), blk.w2, blk.b2)
    err = float(jnp.max(jnp.abs(out - ref)))
    assert err < 2e-2, f"is_deconv=True mismatch, max abs err = {err}"

    # alternate path: bilinear x2 -> ConvRelu -> ConvRelu
    blk2 = DecoderBlockV2(Ci, Cm, Co, is_deconv=False, key=kp2)
    out2 = jax.block_until_ready(blk2(x))
    assert out2.shape == (N, Co, 2 * H, 2 * W) and out2.dtype == x.dtype
    ref2 = _conv3x3_relu_ref(
        _conv3x3_relu_ref(_bilinear2x_ref(x), blk2.w1, blk2.b1), blk2.w2, blk2.b2)
    err2 = float(jnp.max(jnp.abs(out2 - ref2)))
    assert err2 < 2e-2, f"is_deconv=False mismatch, max abs err = {err2}"

    print("KERNEL_OK")
</pallas_src>

<mosaic_0001>
module attributes {stable_mosaic.version = 11 : i64} {
  func.func @_conv3x3_relu_kernel(%arg0: i32, %arg1: memref<1x18x18x4xf32, #tpu.memory_space<vmem>>, %arg2: memref<3x3x4x8xf32, #tpu.memory_space<vmem>>, %arg3: memref<1x8xf32, #tpu.memory_space<vmem>>, %arg4: memref<1x16x16x8xf32, #tpu.memory_space<vmem>>) attributes {dimension_semantics = [#tpu.dimension_semantics<parallel>], iteration_bounds = array<i64: 2>, scalar_prefetch = 0 : i64, scratch_operands = 0 : i64, tpu.core_type = #tpu.core_type<tc>, window_params = [{transform_indices = @transform_0, window_bounds = array<i64: 1, 18, 18, 4>}, {pipeline_mode = #tpu.pipeline_mode<synchronous>, transform_indices = @transform_1, window_bounds = array<i64: 3, 3, 4, 8>}, {pipeline_mode = #tpu.pipeline_mode<synchronous>, transform_indices = @transform_2, window_bounds = array<i64: 1, 8>}, {transform_indices = @transform_3, window_bounds = array<i64: 1, 16, 16, 8>}]} {
    %c0 = arith.constant 0 : index
    %c0_0 = arith.constant 0 : index
    %0 = vector.load %arg3[%c0, %c0_0] : memref<1x8xf32, #tpu.memory_space<vmem>>, vector<1x8xf32>
    %c0_1 = arith.constant 0 : index
    %c0_2 = arith.constant 0 : index
    %c0_3 = arith.constant 0 : index
    %c0_4 = arith.constant 0 : index
    %1 = vector.load %arg2[%c0_1, %c0_2, %c0_3, %c0_4] : memref<3x3x4x8xf32, #tpu.memory_space<vmem>>, vector<1x1x4x8xf32>
    %2 = vector.shape_cast %1 : vector<1x1x4x8xf32> to vector<4x8xf32>
    %c0_5 = arith.constant 0 : index
    %c1 = arith.constant 1 : index
    %c0_6 = arith.constant 0 : index
    %c0_7 = arith.constant 0 : index
    %3 = vector.load %arg2[%c0_5, %c1, %c0_6, %c0_7] : memref<3x3x4x8xf32, #tpu.memory_space<vmem>>, vector<1x1x4x8xf32>
    %4 = vector.shape_cast %3 : vector<1x1x4x8xf32> to vector<4x8xf32>
    %c0_8 = arith.constant 0 : index
    %c2 = arith.constant 2 : index
    %c0_9 = arith.constant 0 : index
    %c0_10 = arith.constant 0 : index
    %5 = vector.load %arg2[%c0_8, %c2, %c0_9, %c0_10] : memref<3x3x4x8xf32, #tpu.memory_space<vmem>>, vector<1x1x4x8xf32>
    %6 = vector.shape_cast %5 : vector<1x1x4x8xf32> to vector<4x8xf32>
    %c1_11 = arith.constant 1 : index
    %c0_12 = arith.constant 0 : index
    %c0_13 = arith.constant 0 : index
    %c0_14 = arith.constant 0 : index
    %7 = vector.load %arg2[%c1_11, %c0_12, %c0_13, %c0_14] : memref<3x3x4x8xf32, #tpu.memory_space<vmem>>, vector<1x1x4x8xf32>
    %8 = vector.shape_cast %7 : vector<1x1x4x8xf32> to vector<4x8xf32>
    %c1_15 = arith.constant 1 : index
    %c1_16 = arith.constant 1 : index
    %c0_17 = arith.constant 0 : index
    %c0_18 = arith.constant 0 : index
    %9 = vector.load %arg2[%c1_15, %c1_16, %c0_17, %c0_18] : memref<3x3x4x8xf32, #tpu.memory_space<vmem>>, vector<1x1x4x8xf32>
    %10 = vector.shape_cast %9 : vector<1x1x4x8xf32> to vector<4x8xf32>
    %c1_19 = arith.constant 1 : index
    %c2_20 = arith.constant 2 : index
    %c0_21 = arith.constant 0 : index
    %c0_22 = arith.constant 0 : index
    %11 = vector.load %arg2[%c1_19, %c2_20, %c0_21, %c0_22] : memref<3x3x4x8xf32, #tpu.memory_space<vmem>>, vector<1x1x4x8xf32>
    %12 = vector.shape_cast %11 : vector<1x1x4x8xf32> to vector<4x8xf32>
    %c2_23 = arith.constant 2 : index
    %c0_24 = arith.constant 0 : index
    %c0_25 = arith.constant 0 : index
    %c0_26 = arith.constant 0 : index
    %13 = vector.load %arg2[%c2_23, %c0_24, %c0_25, %c0_26] : memref<3x3x4x8xf32, #tpu.memory_space<vmem>>, vector<1x1x4x8xf32>
    %14 = vector.shape_cast %13 : vector<1x1x4x8xf32> to vector<4x8xf32>
    %c2_27 = arith.constant 2 : index
    %c1_28 = arith.constant 1 : index
    %c0_29 = arith.constant 0 : index
    %c0_30 = arith.constant 0 : index
    %15 = vector.load %arg2[%c2_27, %c1_28, %c0_29, %c0_30] : memref<3x3x4x8xf32, #tpu.memory_space<vmem>>, vector<1x1x4x8xf32>
    %16 = vector.shape_cast %15 : vector<1x1x4x8xf32> to vector<4x8xf32>
    %c2_31 = arith.constant 2 : index
    %c2_32 = arith.constant 2 : index
    %c0_33 = arith.constant 0 : index
    %c0_34 = arith.constant 0 : index
    %17 = vector.load %arg2[%c2_31, %c2_32, %c0_33, %c0_34] : memref<3x3x4x8xf32, #tpu.memory_space<vmem>>, vector<1x1x4x8xf32>
    %18 = vector.shape_cast %17 : vector<1x1x4x8xf32> to vector<4x8xf32>
    %c0_i32 = arith.constant 0 : i32
    %c16_i32 = arith.constant 16 : i32
    %19 = arith.addi %c0_i32, %c16_i32 : i32
    %c1_i32 = arith.constant 1 : i32
    scf.for %arg5 = %c0_i32 to %19 step %c1_i32  : i32 {
      %c1_i32_36 = arith.constant 1 : i32
      %20 = arith.muli %arg5, %c1_i32_36 : i32
      %c0_i32_37 = arith.constant 0 : i32
      %21 = arith.addi %c0_i32_37, %20 : i32
      %cst = arith.constant 0.000000e+00 : f32
      %22 = vector.broadcast %cst : f32 to vector<16x8xf32>
      %c0_i32_38 = arith.constant 0 : i32
      %23 = arith.addi %21, %c0_i32_38 : i32
      %c0_39 = arith.constant 0 : index
      %24 = arith.index_cast %23 : i32 to index
      %c0_40 = arith.constant 0 : index
      %c0_41 = arith.constant 0 : index
      %25 = vector.load %arg1[%c0_39, %24, %c0_40, %c0_41] : memref<1x18x18x4xf32, #tpu.memory_space<vmem>>, vector<1x1x18x4xf32>
      %26 = vector.shape_cast %25 : vector<1x1x18x4xf32> to vector<1x18x4xf32>
      %27 = vector.shape_cast %26 : vector<1x18x4xf32> to vector<18x4xf32>
      %28 = vector.extract_strided_slice %27 {offsets = [0, 0], sizes = [16, 4], strides = [1, 1]} : vector<18x4xf32> to vector<16x4xf32>
      %cst_42 = arith.constant dense<0.000000e+00> : vector<16x8xf32>
      %29 = tpu.matmul %28, %2, %cst_42 {dimension_numbers = #tpu.dot_dimension_numbers<[1], [0], [0], [1], [0, 0, 1, 1], [], []>} : vector<16x4xf32>, vector<4x8xf32>, vector<16x8xf32> -> vector<16x8xf32>
      %30 = arith.addf %22, %29 : vector<16x8xf32>
      %31 = vector.extract_strided_slice %27 {offsets = [1, 0], sizes = [16, 4], strides = [1, 1]} : vector<18x4xf32> to vector<16x4xf32>
      %cst_43 = arith.constant dense<0.000000e+00> : vector<16x8xf32>
      %32 = tpu.matmul %31, %4, %cst_43 {dimension_numbers = #tpu.dot_dimension_numbers<[1], [0], [0], [1], [0, 0, 1, 1], [], []>} : vector<16x4xf32>, vector<4x8xf32>, vector<16x8xf32> -> vector<16x8xf32>
      %33 = arith.addf %30, %32 : vector<16x8xf32>
      %34 = vector.extract_strided_slice %27 {offsets = [2, 0], sizes = [16, 4], strides = [1, 1]} : vector<18x4xf32> to vector<16x4xf32>
      %cst_44 = arith.constant dense<0.000000e+00> : vector<16x8xf32>
      %35 = tpu.matmul %34, %6, %cst_44 {dimension_numbers = #tpu.dot_dimension_numbers<[1], [0], [0], [1], [0, 0, 1, 1], [], []>} : vector<16x4xf32>, vector<4x8xf32>, vector<16x8xf32> -> vector<16x8xf32>
      %36 = arith.addf %33, %35 : vector<16x8xf32>
      %c1_i32_45 = arith.constant 1 : i32
      %37 = arith.addi %21, %c1_i32_45 : i32
      %c0_46 = arith.constant 0 : index
      %38 = arith.index_cast %37 : i32 to index
      %c0_47 = arith.constant 0 : index
      %c0_48 = arith.constant 0 : index
      %39 = vector.load %arg1[%c0_46, %38, %c0_47, %c0_48] : memref<1x18x18x4xf32, #tpu.memory_space<vmem>>, vector<1x1x18x4xf32>
      %40 = vector.shape_cast %39 : vector<1x1x18x4xf32> to vector<1x18x4xf32>
      %41 = vector.shape_cast %40 : vector<1x18x4xf32> to vector<18x4xf32>
      %42 = vector.extract_strided_slice %41 {offsets = [0, 0], sizes = [16, 4], strides = [1, 1]} : vector<18x4xf32> to vector<16x4xf32>
      %cst_49 = arith.constant dense<0.000000e+00> : vector<16x8xf32>
      %43 = tpu.matmul %42, %8, %cst_49 {dimension_numbers = #tpu.dot_dimension_numbers<[1], [0], [0], [1], [0, 0, 1, 1], [], []>} : vector<16x4xf32>, vector<4x8xf32>, vector<16x8xf32> -> vector<16x8xf32>
      %44 = arith.addf %36, %43 : vector<16x8xf32>
      %45 = vector.extract_strided_slice %41 {offsets = [1, 0], sizes = [16, 4], strides = [1, 1]} : vector<18x4xf32> to vector<16x4xf32>
      %cst_50 = arith.constant dense<0.000000e+00> : vector<16x8xf32>
      %46 = tpu.matmul %45, %10, %cst_50 {dimension_numbers = #tpu.dot_dimension_numbers<[1], [0], [0], [1], [0, 0, 1, 1], [], []>} : vector<16x4xf32>, vector<4x8xf32>, vector<16x8xf32> -> vector<16x8xf32>
      %47 = arith.addf %44, %46 : vector<16x8xf32>
      %48 = vector.extract_strided_slice %41 {offsets = [2, 0], sizes = [16, 4], strides = [1, 1]} : vector<18x4xf32> to vector<16x4xf32>
      %cst_51 = arith.constant dense<0.000000e+00> : vector<16x8xf32>
      %49 = tpu.matmul %48, %12, %cst_51 {dimension_numbers = #tpu.dot_dimension_numbers<[1], [0], [0], [1], [0, 0, 1, 1], [], []>} : vector<16x4xf32>, vector<4x8xf32>, vector<16x8xf32> -> vector<16x8xf32>
      %50 = arith.addf %47, %49 : vector<16x8xf32>
      %c2_i32 = arith.constant 2 : i32
      %51 = arith.addi %21, %c2_i32 : i32
      %c0_52 = arith.constant 0 : index
      %52 = arith.index_cast %51 : i32 to index
      %c0_53 = arith.constant 0 : index
      %c0_54 = arith.constant 0 : index
      %53 = vector.load %arg1[%c0_52, %52, %c0_53, %c0_54] : memref<1x18x18x4xf32, #tpu.memory_space<vmem>>, vector<1x1x18x4xf32>
      %54 = vector.shape_cast %53 : vector<1x1x18x4xf32> to vector<1x18x4xf32>
      %55 = vector.shape_cast %54 : vector<1x18x4xf32> to vector<18x4xf32>
      %56 = vector.extract_strided_slice %55 {offsets = [0, 0], sizes = [16, 4], strides = [1, 1]} : vector<18x4xf32> to vector<16x4xf32>
      %cst_55 = arith.constant dense<0.000000e+00> : vector<16x8xf32>
      %57 = tpu.matmul %56, %14, %cst_55 {dimension_numbers = #tpu.dot_dimension_numbers<[1], [0], [0], [1], [0, 0, 1, 1], [], []>} : vector<16x4xf32>, vector<4x8xf32>, vector<16x8xf32> -> vector<16x8xf32>
      %58 = arith.addf %50, %57 : vector<16x8xf32>
      %59 = vector.extract_strided_slice %55 {offsets = [1, 0], sizes = [16, 4], strides = [1, 1]} : vector<18x4xf32> to vector<16x4xf32>
      %cst_56 = arith.constant dense<0.000000e+00> : vector<16x8xf32>
      %60 = tpu.matmul %59, %16, %cst_56 {dimension_numbers = #tpu.dot_dimension_numbers<[1], [0], [0], [1], [0, 0, 1, 1], [], []>} : vector<16x4xf32>, vector<4x8xf32>, vector<16x8xf32> -> vector<16x8xf32>
      %61 = arith.addf %58, %60 : vector<16x8xf32>
      %62 = vector.extract_strided_slice %55 {offsets = [2, 0], sizes = [16, 4], strides = [1, 1]} : vector<18x4xf32> to vector<16x4xf32>
      %cst_57 = arith.constant dense<0.000000e+00> : vector<16x8xf32>
      %63 = tpu.matmul %62, %18, %cst_57 {dimension_numbers = #tpu.dot_dimension_numbers<[1], [0], [0], [1], [0, 0, 1, 1], [], []>} : vector<16x4xf32>, vector<4x8xf32>, vector<16x8xf32> -> vector<16x8xf32>
      %64 = arith.addf %61, %63 : vector<16x8xf32>
      %65 = vector.broadcast %0 : vector<1x8xf32> to vector<16x8xf32>
      %66 = arith.addf %64, %65 : vector<16x8xf32>
      %cst_58 = arith.constant 0.000000e+00 : f32
      %67 = vector.broadcast %cst_58 : f32 to vector<16x8xf32>
      %68 = arith.maximumf %66, %67 : vector<16x8xf32>
      %69 = vector.shape_cast %68 : vector<16x8xf32> to vector<1x16x8xf32>
      %c0_59 = arith.constant 0 : index
      %70 = arith.index_cast %21 : i32 to index
      %c0_60 = arith.constant 0 : index
      %c0_61 = arith.constant 0 : index
      %71 = vector.load %arg4[%c0_59, %70, %c0_60, %c0_61] : memref<1x16x16x8xf32, #tpu.memory_space<vmem>>, vector<1x1x16x8xf32>
      %72 = vector.shape_cast %71 : vector<1x1x16x8xf32> to vector<1x16x8xf32>
      %73 = vector.shape_cast %69 : vector<1x16x8xf32> to vector<1x1x16x8xf32>
      tpu.vector_store %arg4[%c0_59, %70, %c0_60, %c0_61], %73 {strides = array<i32>} : memref<1x16x16x8xf32, #tpu.memory_space<vmem>>, vector<1x1x16x8xf32>,
    }
    %c16_i32_35 = arith.constant 16 : i32
    return
  }
  func.func @transform_0(%arg0: i32) -> (i32, i32, i32, i32) {
    %c0_i32 = arith.constant 0 : i32
    %c0_i32_0 = arith.constant 0 : i32
    %c0_i32_1 = arith.constant 0 : i32
    %c0_i32_2 = arith.constant 0 : i32
    return %arg0, %c0_i32, %c0_i32_0, %c0_i32_1 : i32, i32, i32, i32
  }
  func.func @transform_1(%arg0: i32) -> (i32, i32, i32, i32) {
    %c0_i32 = arith.constant 0 : i32
    %c0_i32_0 = arith.constant 0 : i32
    %c0_i32_1 = arith.constant 0 : i32
    %c0_i32_2 = arith.constant 0 : i32
    %c0_i32_3 = arith.constant 0 : i32
    return %c0_i32, %c0_i32_0, %c0_i32_1, %c0_i32_2 : i32, i32, i32, i32
  }
  func.func @transform_2(%arg0: i32) -> (i32, i32) {
    %c0_i32 = arith.constant 0 : i32
    %c0_i32_0 = arith.constant 0 : i32
    %c0_i32_1 = arith.constant 0 : i32
    return %c0_i32, %c0_i32_0 : i32, i32
  }
  func.func @transform_3(%arg0: i32) -> (i32, i32, i32, i32) {
    %c0_i32 = arith.constant 0 : i32
    %c0_i32_0 = arith.constant 0 : i32
    %c0_i32_1 = arith.constant 0 : i32
    %c0_i32_2 = arith.constant 0 : i32
    return %arg0, %c0_i32, %c0_i32_0, %c0_i32_1 : i32, i32, i32, i32
  }
}

</mosaic_0001>

<bundles_post_ra>
// kernel: tpu_custom_call.1
= control target key start
LH: loop header
LB: loop body
LE: loop exit
PB: predicated region body
PF: predicated region fallthrough
CT: control target
= control target key end

     0   :  { %s1287_s12 = smov 0   ;;  %s1449_s0 = inlined_call_operand.vmem [shape: f32[2,18,18,4], index: 0, kind: input, shape index: {}]   ;;  %s1450_s1 = inlined_call_operand.vmem [shape: f32[3,3,4,8], index: 1, kind: input, shape index: {}]   ;;  %s1451_s2 = inlined_call_operand.vmem [shape: f32[1,8], index: 2, kind: input, shape index: {}]   ;;  %s1452_s3 = inlined_call_operand.vmem [shape: f32[2,16,16,8], index: 3, kind: output, shape index: {}]  }
   0x1 LB: > { %s1092_s13 = sadd.s32 4294967295, %s1261_s12   ;;  %p1096_p0 = scmp.ge.s32.totalorder %s1261_s12, 1  ;;  %s1261_s12 = sphi %s1287_s12, %s13_s12  }
   0x2   : > { %p137_p1 = scmp.lt.s32.totalorder %s1261_s12, 3 }
   0x4   : > { %p138_p2 = pnand %p1096_p0, %p137_p1 }
   0x5   : > { %p161_p3 = scmp.lt.s32.totalorder (!%p138_p2), %s1092_s13, 1  ;;  %v1298_v0 = vld [vmem:[%s1451_s2] ss:$0 sm:$0xff] (!%p138_p2)  ;;  %v1308_v2 = vld [vmem:[%s1450_s1 + $0x4] sm:$0xf] (!%p138_p2)  ;;  %s1355_s17 = smov (!%p138_p2), 0  }
   0x6   : > { %141 = sbr.rel (%p138_p2) target bundleno = 278 (0x116), region = 32  ;;  %v1303_v1 = vld [vmem:[%s1450_s1] sm:$0xf] (!%p138_p2)  ;;  %v1313_v3 = vld [vmem:[%s1450_s1 + $0x8] sm:$0xf] (!%p138_p2) }
   0x7   : > { %v1318_v4 = vld [vmem:[%s1450_s1 + $0xc] sm:$0xf] (!%p138_p2)  ;;  %v1323_v5 = vld [vmem:[%s1450_s1 + $0x10] sm:$0xf] (!%p138_p2)  ;;  %v1328_v6 = vld [vmem:[%s1450_s1 + $0x14] sm:$0xf] (!%p138_p2) }
   0x8   : > { %v1333_v7 = vld [vmem:[%s1450_s1 + $0x18] sm:$0xf] (!%p138_p2)  ;;  %v1338_v8 = vld [vmem:[%s1450_s1 + $0x1c] sm:$0xf] (!%p138_p2)  ;;  %v1343_v9 = vld [vmem:[%s1450_s1 + $0x20] sm:$0xf] (!%p138_p2) }
   0xd   : > { %s1454_s13 = smov (!%p161_p3, %s1092_s13), 1 }
   0xe   : > { %s1234_s7 = smul.u32 432, %s1454_s13  ;;  %s1145_s8 = sshll.u32 %s1454_s13, 8 }
   0xf   : > { %s1348_s11 = scalar_lea.vmem %s1452_s3, %s1145_s8 }
  0x10   : > { %s1353_s16 = scalar_lea.vmem %s1449_s0, %s1234_s7 }
  0x11 LB: >> { %vm214_vm0 = vcmask 1043456   ;;  %s195_s13 = smul.u32 24, %s1265_s17  ;;  %vm203_vm1 = vcmask 1046528   ;;  %vm209_vm2 = vcmask 31744   ;;  %vm375_vm3 = vcmask 1045504   ;;  %s1142_s19 = sshll.u32 %s1265_s17, 4  ;;  %s1265_s17 = sphi %s1355_s17, %s194_s17  }
  0x12   : >> { %1193 = vmatprep.subr.msk.mxu0 %vm214_vm0, %v1323_v5  ;;  %1173 = vmatprep.subr.msk.mxu1 %vm214_vm0, %v1308_v2  ;;  %s1018_s20 = scalar_lea.vmem %s1348_s11, %s1142_s19  ;;  %vm1019_vm4 = vcmask 64512   ;;  %s194_s17 = sadd.s32 1, %s1265_s17  }
  0x13   : >> { %1194 = vmatpush3.msk.msra.mxu0 %vm214_vm0, %v1323_v5  ;;  %1174 = vmatpush3.msk.msra.mxu1 %vm214_vm0, %v1308_v2  ;;  %s1374_s18 = scalar_lea.vmem %s1353_s16, %s195_s13  ;;  %p191_p4 = scmp.ge.s32.totalorder %s194_s17, 16  }
  0x14   : >> { %1198 = vmatprep.subr.msk.mxu0 %vm214_vm0, %v1328_v6  ;;  %1178 = vmatprep.subr.msk.mxu1 %vm214_vm0, %v1303_v1  ;;  %v197_v10 = vld [vmem:[%s1374_s18] sm:$0xff]  ;;  %v198_v11 = vld [vmem:[%s1374_s18 + $0x8] sm:$0xff]  ;;  %v1117_v12 = vld [vmem:[%s1374_s18 + $0x18] sm:$0xff] }
  0x15   : >> { %v204_v13 = vrot.slane %v197_v10, 1  ;;  %v205_v14 = vrot.slane %v198_v11, 1  ;;  %v1118_v15 = vld [vmem:[%s1374_s18 + $0x20] sm:$0xff]  ;;  %v558_v16 = vrot.slane %v1117_v12, 1  ;;  %v199_v17 = vld [vmem:[%s1374_s18 + $0x10] sm:$0x3] }
  0x16   : >> { %v559_v18 = vrot.slane %v1118_v15, 1  ;;  %v207_v19 = vrot.slane %v199_v17, 1  ;;  %v1119_v20 = vld [vmem:[%s1374_s18 + $0x28] sm:$0x3]  ;;  %v647_v21 = vrot.slane %v1117_v12, 2  ;;  %v648_v24 = vrot.slane %v1118_v15, 2 }
  0x17   : >> { %v206_v22 = vsel %vm203_vm1, %v204_v13, %v205_v14  ;;  %v561_v23 = vrot.slane %v1119_v20, 1  ;;  %v650_v29 = vrot.slane %v1119_v20, 2  ;;  %v376_v30 = vrot.slane %v197_v10, 2  ;;  %v1129_v34 = vld [vmem:[%s1374_s18 + $0x30] sm:$0xff]  ;;  %v1130_v36 = vld [vmem:[%s1374_s18 + $0x38] sm:$0xff] }
  0x18   : >> { %1175 = vmatprep.mubr.msk.f32.mxu1 %vm209_vm2, %v206_v22  ;;  %v560_v25 = vsel %vm203_vm1, %v558_v16, %v559_v18  ;;  %v208_v26 = vsel %vm203_vm1, %v205_v14, %v207_v19  ;;  %v649_v28 = vsel %vm375_vm3, %v647_v21, %v648_v24  ;;  %v377_v31 = vrot.slane %v198_v11, 2  ;;  %v1131_v40 = vld [vmem:[%s1374_s18 + $0x40] sm:$0x3] }
  0x19   : >> { %1195 = vmatprep.mubr.msk.f32.mxu0 %vm209_vm2, %v560_v25  ;;  %1176 = vmatmul.mubr.msk.f32.vlgmr.msra.gmra.mrb[0].mxu1 %vm209_vm2, %v208_v26  ;;  %v562_v27 = vsel %vm203_vm1, %v559_v18, %v561_v23  ;;  %v651_v32 = vsel %vm375_vm3, %v648_v24, %v650_v29  ;;  %v379_v35 = vrot.slane %v199_v17, 2  ;;  %v829_v37 = vrot.slane %v1129_v34, 1 }
  0x1a   : >> { %1196 = vmatmul.mubr.msk.f32.vlgmr.msra.gmra.mrb[0].mxu0 %vm209_vm2, %v562_v27  ;;  %1179 = vmatpush3.msk.msra.mxu1 %vm214_vm0, %v1303_v1  ;;  %v378_v33 = vsel %vm375_vm3, %v376_v30, %v377_v31  ;;  %v830_v38 = vrot.slane %v1130_v36, 1  ;;  %v832_v42 = vrot.slane %v1131_v40, 1  ;;  %v918_v43 = vrot.slane %v1129_v34, 2 }
  0x1b   : >> { %1199 = vmatpush3.msk.msra.mxu0 %vm214_vm0, %v1328_v6  ;;  %1180 = vmatprep.mubr.msk.f32.mxu1 %vm209_vm2, %v197_v10  ;;  %v380_v39 = vsel %vm375_vm3, %v377_v31, %v379_v35  ;;  %v919_v44 = vrot.slane %v1130_v36, 2  ;;  %v921_v47 = vrot.slane %v1131_v40, 2 }
  0x1c   : >> { %1200 = vmatprep.mubr.msk.f32.mxu0 %vm209_vm2, %v649_v28  ;;  %1203 = vmatprep.subr.msk.mxu0 %vm214_vm0, %v1333_v7  ;;  %v831_v41 = vsel %vm203_vm1, %v829_v37, %v830_v38  ;;  %v833_v45 = vsel %vm203_vm1, %v830_v38, %v832_v42 }
  0x1d   : >> { %1183 = vmatprep.subr.msk.mxu1 %vm214_vm0, %v1313_v3  ;;  %v920_v46 = vsel %vm375_vm3, %v918_v43, %v919_v44  ;;  %v922_v48 = vsel %vm375_vm3, %v919_v44, %v921_v47 }
  0x21   : >> { %1181 = vmatmul.mubr.msk.f32.vlgmr.msra.gmra.mrb[0].mxu1 %vm209_vm2, %v198_v11 }
  0x22   : >> { %1201 = vmatmul.mubr.msk.f32.vlgmr.msra.gmra.mrb[0].mxu0 %vm209_vm2, %v651_v32  ;;  %1184 = vmatpush3.msk.msra.mxu1 %vm214_vm0, %v1313_v3 }
  0x23   : >> { %1204 = vmatpush3.msk.msra.mxu0 %vm214_vm0, %v1333_v7  ;;  %1185 = vmatprep.mubr.msk.f32.mxu1 %vm209_vm2, %v378_v33 }
  0x24   : >> { %1205 = vmatprep.mubr.msk.f32.mxu0 %vm209_vm2, %v1129_v34  ;;  %1208 = vmatprep.subr.msk.mxu0 %vm214_vm0, %v1338_v8 }
  0x25   : >> { %1188 = vmatprep.subr.msk.mxu1 %vm214_vm0, %v1318_v4 }
  0x29   : >> { %1186 = vmatmul.mubr.msk.f32.vlgmr.msra.gmra.mrb[0].mxu1 %vm209_vm2, %v380_v39 }
  0x2a   : >> { %1206 = vmatmul.mubr.msk.f32.vlgmr.msra.gmra.mrb[0].mxu0 %vm209_vm2, %v1130_v36  ;;  %1189 = vmatpush3.msk.msra.mxu1 %vm214_vm0, %v1318_v4 }
  0x2b   : >> { %1209 = vmatpush3.msk.msra.mxu0 %vm214_vm0, %v1338_v8  ;;  %1190 = vmatprep.mubr.msk.f32.mxu1 %vm209_vm2, %v1117_v12 }
  0x2c   : >> { %1210 = vmatprep.mubr.msk.f32.mxu0 %vm209_vm2, %v831_v41  ;;  %1213 = vmatprep.subr.msk.mxu0 %vm214_vm0, %v1343_v9 }
  0x31   : >> { %1191 = vmatmul.mubr.msk.f32.vlgmr.msra.gmra.mrb[0].mxu1 %vm209_vm2, %v1118_v15 }
  0x32   : >> { %1211 = vmatmul.mubr.msk.f32.vlgmr.msra.gmra.mrb[0].mxu0 %vm209_vm2, %v833_v45 }
  0x33   : >> { %1214 = vmatpush3.msk.msra.mxu0 %vm214_vm0, %v1343_v9  ;;  %1215 = vmatprep.mubr.msk.f32.mxu0 %vm209_vm2, %v920_v46 }
  0x3a   : >> { %1216 = vmatmul.mubr.msk.f32.vlgmr.msra.gmra.mrb[0].mxu0 %vm209_vm2, %v922_v48 }
 0x104   : >> { %v1192_v49 = vpop.f32.mrb[0].mxu1 }
 0x105   : >> { %v546_v50 = vpop.f32.mrb[1].mxu1 }
 0x10d   : >> { %v1217_v51 = vpop.f32.mrb[0].mxu0 }
 0x10e   : >> { %v1218_v52 = vadd.f32 %v1217_v51, %v1192_v49  ;;  %v996_v53 = vpop.f32.mrb[1].mxu0 }
 0x10f   : >> { %v1219_v54 = vadd.f32 %v996_v53, %v546_v50  ;;  %193 = sbr.rel (!%p191_p4) target bundleno = 17 (0x11), region = 81 }
 0x110   : >> { %v1014_v55 = vadd.f32 %v1218_v52, %v1298_v0 }
 0x111   : >> { %v1013_v56 = vadd.f32 %v1219_v54, %v1298_v0 }
 0x112   : >> { %v1016_v57 = vmax.f32 %v1014_v55, 0.0 }
 0x113   : >> { %v1015_v58 = vmax.f32 %v1013_v56, 0.0 }
 0x114   : >> { %1021 = vst.msk [vmem:[%s1018_s20 + $0x8] sm:$0xff] %vm1019_vm4, %v1016_v57 }
 0x115   : >> { %1020 = vst.msk [vmem:[%s1018_s20] sm:$0xff] %vm1019_vm4, %v1015_v58 }
 0x116 PF: > { %s13_s12 = sadd.s32 1, %s1261_s12  }
 0x117   : > { %p10_p5 = scmp.ge.s32.totalorder %s13_s12, 4  }
 0x119   :  { %12 = sbr.rel (!%p10_p5) target bundleno = 1 (0x1), region = 92 }

</bundles_post_ra>
